<compile_context>
chip_gen: v6e
topology: v6e:2x2x1
jax: 0.10.0
libtpu: 0.0.40
codegen_flags: <defaults>
</compile_context>

<pallas_src>
import functools

import jax
import jax.numpy as jnp
from jax import lax
from jax.experimental import pallas as pl
from jax.experimental.pallas import tpu as pltpu


def _round_up(x, m):
    return ((x + m - 1) // m) * m


def _linear_kernel(x_ref, w_ref, b_ref, o_ref, *, compute_dtype):
    # x_ref: (TN, H) f32         w_ref: (H, E_pad) compute dtype (resident)
    # b_ref: (1, E_pad) f32      o_ref: (TN, E_pad) out dtype
    # Fused cast: read x once from HBM as f32, narrow in-register for the MXU.
    x = x_ref[...].astype(compute_dtype)
    acc = jnp.dot(x, w_ref[...], preferred_element_type=jnp.float32)
    o_ref[...] = (acc + b_ref[...]).astype(o_ref.dtype)


def semantic_encoder_linear(x, w_t, bias_row, *, tile_n=1024,
                            compute_dtype=jnp.bfloat16,
                            out_dtype=jnp.float32):
    """y = x @ w_t + bias_row, tiled over the batch axis.

    Args:
      x:        (N, H) activations (f32; cast to compute dtype inside kernel).
      w_t:      (H, E_pad) pre-transposed weight in the compute dtype.
      bias_row: (1, E_pad) float32 bias row.
    Returns:
      (N, E_pad) in `out_dtype`.
    """
    n, hidden = x.shape
    enc_pad = w_t.shape[1]

    x_bytes = jnp.dtype(x.dtype).itemsize
    w_bytes = jnp.dtype(w_t.dtype).itemsize
    out_bytes = jnp.dtype(out_dtype).itemsize

    # --- Tile selection ---------------------------------------------------
    # Per-step VMEM: 2x (double-buffered) x-tile + out-tile, plus the resident
    # (but still double-buffered by default) weight and bias blocks.  Keep the
    # total under ~12 MiB so it fits the smallest default scoped-VMEM limit
    # (v5e: 16 MiB) on every generation with no compiler-param override.
    budget = 12 * 1024 * 1024
    fixed = 2 * (hidden * enc_pad * w_bytes + enc_pad * 4)
    per_row = 2 * (hidden * x_bytes + enc_pad * out_bytes)
    max_tn = max((budget - fixed) // per_row, 8)
    tn = min(tile_n, int(max_tn))
    # Guarantee >= 2 grid steps for moderate N so the "parallel" batch axis
    # can shard across both TensorCores on v7x.
    tn = min(tn, _round_up(pl.cdiv(max(n, 1), 2), 8))
    tn = max((tn // 8) * 8, 8)

    # Ragged last block is handled by Pallas (out-of-range rows are never
    # written because out_shape is exactly (n, enc_pad)) — no jnp.pad pass.
    grid = (pl.cdiv(n, tn),)

    cost = pl.CostEstimate(
        flops=2 * n * hidden * enc_pad,
        transcendentals=0,
        bytes_accessed=(n * hidden * x_bytes
                        + hidden * enc_pad * w_bytes
                        + enc_pad * 4
                        + n * enc_pad * out_bytes),
    )

    return pl.pallas_call(
        functools.partial(_linear_kernel, compute_dtype=compute_dtype),
        out_shape=jax.ShapeDtypeStruct((n, enc_pad), out_dtype),
        grid=grid,
        in_specs=[
            pl.BlockSpec((tn, hidden), lambda i: (i, 0)),        # x tile (pipelined)
            pl.BlockSpec((hidden, enc_pad), lambda i: (0, 0)),   # weight (resident)
            pl.BlockSpec((1, enc_pad), lambda i: (0, 0)),        # bias   (resident)
        ],
        out_specs=pl.BlockSpec((tn, enc_pad), lambda i: (i, 0)),
        compiler_params=pltpu.CompilerParams(
            dimension_semantics=("parallel",)),
        cost_estimate=cost,
    )(x, w_t, bias_row)


class SemanticEncoderPallas:
    """Mirrors SemanticEncoder.__init__ parameter shapes; forward takes the
    pooled BERT output directly (tokenizer/BERT are external — see TODO)."""

    def __init__(self, bert_hidden_dim, encoding_dim, key,
                 compute_dtype=jnp.bfloat16, out_dtype=jnp.float32,
                 tile_n=1024):
        self.bert_hidden_dim = bert_hidden_dim
        self.encoding_dim = encoding_dim
        self.compute_dtype = compute_dtype
        self.out_dtype = out_dtype
        self.tile_n = tile_n

        kw, kb = jax.random.split(key)
        # nn.Linear layout: weight (E, H), bias (E,)
        bound = 1.0 / (bert_hidden_dim ** 0.5)
        self.weight = jax.random.uniform(
            kw, (encoding_dim, bert_hidden_dim),
            minval=-bound, maxval=bound, dtype=jnp.float32)
        self.bias = jax.random.uniform(
            kb, (encoding_dim,),
            minval=-bound, maxval=bound, dtype=jnp.float32)

        # One-time kernel prep (out of the hot path):
        #   - pad E to a multiple of 128 for lane-dense output stores,
        #   - pre-transpose to (H, E_pad),
        #   - cast the weight to the MXU compute dtype (f32 accumulation
        #     happens inside the kernel).
        enc_pad = _round_up(encoding_dim, 128)
        w_pad = jnp.zeros((enc_pad, bert_hidden_dim), jnp.float32)
        w_pad = w_pad.at[:encoding_dim].set(self.weight)
        self._w_t = jnp.asarray(w_pad.T, dtype=compute_dtype)        # (H, E_pad)
        self._bias_row = jnp.zeros((1, enc_pad), jnp.float32)
        self._bias_row = self._bias_row.at[0, :encoding_dim].set(self.bias)
        self._enc_pad = enc_pad

    def forward(self, pooled_output):
        # TODO(synk): tokenizer + pretrained BERT forward are external; this
        # consumes the pooled BERT output (N, bert_hidden_dim) directly.
        y = semantic_encoder_linear(pooled_output, self._w_t, self._bias_row,
                                    tile_n=self.tile_n,
                                    compute_dtype=self.compute_dtype,
                                    out_dtype=self.out_dtype)
        if self._enc_pad != self.encoding_dim:
            # Single trailing slice, only when E is not lane-aligned.
            y = lax.slice(y, (0, 0), (y.shape[0], self.encoding_dim))
        return y


if __name__ == "__main__":
    key = jax.random.PRNGKey(0)
    k_params, k_x = jax.random.split(key)

    # Small stand-ins for (bert_hidden_dim=768, encoding_dim=...).
    # N is deliberately NOT a multiple of 8 to exercise the ragged last block.
    N = 10                # batch of texts
    BERT_HIDDEN = 256     # bert_hidden_dim (small synthetic)
    ENC_DIM = 128         # encoding_dim (lane-aligned -> no trailing slice)

    encoder = SemanticEncoderPallas(BERT_HIDDEN, ENC_DIM, k_params)

    # Synthetic pooled BERT output (stands in for bert_model(...)[1]).
    pooled = jax.random.normal(k_x, (N, BERT_HIDDEN), dtype=jnp.float32)

    out = encoder.forward(pooled)
    out = jax.block_until_ready(out)
    assert out.shape == (N, ENC_DIM)
    assert out.dtype == jnp.float32

    # Reference checks.
    ref_f32 = pooled @ encoder.weight.T + encoder.bias
    # bf16-consistent reference (same rounding of inputs, f32 accumulation).
    ref_bf16 = (jnp.dot(pooled.astype(jnp.bfloat16),
                        encoder.weight.T.astype(jnp.bfloat16),
                        preferred_element_type=jnp.float32)
                + encoder.bias)
    assert jnp.allclose(out, ref_bf16, atol=1e-3, rtol=1e-3), \
        float(jnp.max(jnp.abs(out - ref_bf16)))
    assert jnp.allclose(out, ref_f32, atol=5e-2, rtol=0), \
        float(jnp.max(jnp.abs(out - ref_f32)))

    print("KERNEL_OK")
</pallas_src>

<mosaic_0001>
module attributes {stable_mosaic.version = 11 : i64} {
  func.func @_linear_kernel(%arg0: i32, %arg1: memref<8x256xf32, #tpu.memory_space<vmem>>, %arg2: memref<256x128xbf16, #tpu.memory_space<vmem>>, %arg3: memref<1x128xf32, #tpu.memory_space<vmem>>, %arg4: memref<8x128xf32, #tpu.memory_space<vmem>>) attributes {dimension_semantics = [#tpu.dimension_semantics<parallel>], iteration_bounds = array<i64: 2>, scalar_prefetch = 0 : i64, scratch_operands = 0 : i64, tpu.core_type = #tpu.core_type<tc>, window_params = [{transform_indices = @transform_0, window_bounds = array<i64: 8, 256>}, {pipeline_mode = #tpu.pipeline_mode<synchronous>, transform_indices = @transform_1, window_bounds = array<i64: 256, 128>}, {pipeline_mode = #tpu.pipeline_mode<synchronous>, transform_indices = @transform_2, window_bounds = array<i64: 1, 128>}, {transform_indices = @transform_3, window_bounds = array<i64: 8, 128>}]} {
    %c0 = arith.constant 0 : index
    %c0_0 = arith.constant 0 : index
    %0 = vector.load %arg1[%c0, %c0_0] : memref<8x256xf32, #tpu.memory_space<vmem>>, vector<8x256xf32>
    %1 = arith.truncf %0 : vector<8x256xf32> to vector<8x256xbf16>
    %c0_1 = arith.constant 0 : index
    %c0_2 = arith.constant 0 : index
    %2 = vector.load %arg2[%c0_1, %c0_2] : memref<256x128xbf16, #tpu.memory_space<vmem>>, vector<256x128xbf16>
    %cst = arith.constant dense<0.000000e+00> : vector<8x128xf32>
    %3 = tpu.matmul %1, %2, %cst {dimension_numbers = #tpu.dot_dimension_numbers<[1], [0], [0], [1], [0, 0, 1, 1], [], []>} : vector<8x256xbf16>, vector<256x128xbf16>, vector<8x128xf32> -> vector<8x128xf32>
    %c0_3 = arith.constant 0 : index
    %c0_4 = arith.constant 0 : index
    %4 = vector.load %arg3[%c0_3, %c0_4] : memref<1x128xf32, #tpu.memory_space<vmem>>, vector<1x128xf32>
    %5 = vector.broadcast %4 : vector<1x128xf32> to vector<8x128xf32>
    %6 = arith.addf %3, %5 : vector<8x128xf32>
    %c0_5 = arith.constant 0 : index
    %c0_6 = arith.constant 0 : index
    %7 = vector.load %arg4[%c0_5, %c0_6] : memref<8x128xf32, #tpu.memory_space<vmem>>, vector<8x128xf32>
    tpu.vector_store %arg4[%c0_5, %c0_6], %6 {strides = array<i32>} : memref<8x128xf32, #tpu.memory_space<vmem>>, vector<8x128xf32>,
    return
  }
  func.func @transform_0(%arg0: i32) -> (i32, i32) {
    %c0_i32 = arith.constant 0 : i32
    %c0_i32_0 = arith.constant 0 : i32
    return %arg0, %c0_i32 : i32, i32
  }
  func.func @transform_1(%arg0: i32) -> (i32, i32) {
    %c0_i32 = arith.constant 0 : i32
    %c0_i32_0 = arith.constant 0 : i32
    %c0_i32_1 = arith.constant 0 : i32
    return %c0_i32, %c0_i32_0 : i32, i32
  }
  func.func @transform_2(%arg0: i32) -> (i32, i32) {
    %c0_i32 = arith.constant 0 : i32
    %c0_i32_0 = arith.constant 0 : i32
    %c0_i32_1 = arith.constant 0 : i32
    return %c0_i32, %c0_i32_0 : i32, i32
  }
  func.func @transform_3(%arg0: i32) -> (i32, i32) {
    %c0_i32 = arith.constant 0 : i32
    %c0_i32_0 = arith.constant 0 : i32
    return %arg0, %c0_i32 : i32, i32
  }
}

</mosaic_0001>

<bundles_post_ra>
// kernel: tpu_custom_call.1
= control target key start
LH: loop header
LB: loop body
LE: loop exit
PB: predicated region body
PF: predicated region fallthrough
CT: control target
= control target key end

     0   :  { %8 = vsyncpa [#allocation3], 0  ;;  %s924_s0 = inlined_call_operand.hbm [shape: f32[10,256], index: 0, kind: input, shape index: {}]   ;;  %s925_s1 = inlined_call_operand.hbm [shape: bf16[256,128], index: 1, kind: input, shape index: {}]   ;;  %s926_s2 = inlined_call_operand.vmem [shape: f32[1,128], index: 2, kind: input, shape index: {}]   ;;  %s927_s3 = inlined_call_operand.hbm [shape: f32[10,128], index: 3, kind: output, shape index: {}]  }
   0x1   :  { %10 = vsyncpa [#allocation3 + $0x1], 0 }
   0x2   :  { %11 = vsyncpa [#allocation6], 0 }
   0x3   :  { %12 = vsyncpa [#allocation4], 0 }
   0x4   :  { %14 = vsyncpa [#allocation4 + $0x1], 0  ;;  %s756_s12 = smov 0   ;;  %s758_s13 = smov 0  }
   0x5   :  { %s760_s14 = smov 0   ;;  %s762_s15 = smov 0  }
   0x6 LB: > { %s777_s16 = sadd.s32 4294967295, %s729_s15   ;;  %s477_s17 = sadd.s32 4294967294, %s729_s15   ;;  %s729_s15 = sphi %s762_s15, %s949_s15   ;;  %s725_s14 = sphi %s760_s14, %s948_s14   ;;  %s721_s13 = sphi %s758_s13, %s947_s13   ;;  %s717_s12 = sphi %s756_s12, %s946_s12  }
   0x7   : > { %p40_p0 = scmp.ne.s32.totalorder %s721_s13, %s717_s12  ;;  %p928_p1 = scmp.eq.s32.totalorder %s777_s16, 0 }
   0x8   : > { %p112_p3 = scmp.eq.s32.totalorder %s477_s17, 1  ;;  %p478_p5 = scmp.ge.s32.totalorder %s729_s15, 1 }
   0x9   : > { %p786_p4 = por %p928_p1, %p40_p0  ;;  %p119_p7 = scmp.lt.s32.totalorder %s729_s15, 3 }
   0xa   : > { %p791_p6 = por %p112_p3, %p40_p0  ;;  %s731_s21 = smov [#allocation5]  }
   0xb   : > { %s932_s18 = scalar_select %p786_p4, 1, 0 }
   0xc   : > { %s933_s19 = scalar_select %p791_p6, 1, 0 }
   0xd   : > { %p796_p8 = pnand %p478_p5, %p119_p7  ;;  %s131_s22 = sshll.u32 %s731_s21, 4  ;;  %s132_s22 = int_to_ptr.vmem [resolvable:$true] %s131_s22 }
   0xe   : > { %s810_s24 = sadd.s32 1, %s729_s15   ;;  %s27_s25 = sadd.s32 1, %s725_s14 }
   0xf   : > { %s934_s20 = scalar_select %p796_p8, 1, 0 }
  0x10   : > { %p540_p9 = pneg %p796_p8  ;;  %s24_s26 = ssub.s32 %s729_s15, %s810_s24 }
  0x11   : > { %s618_s27 = scalar_lea.vmem %s132_s22, 2048  ;;  %p626_p5 = scmp.lt.s32.totalorder %s132_s22, %s132_s22 }
  0x12   : > { %p805_p11 = pnand %p540_p9, %p928_p1  ;;  %p619_p13 = scmp.ne.s32.totalorder %s132_s22, %s618_s27 }
  0x13   : > { %p627_p7 = scmp.lt.s32.totalorder %s618_s27, %s618_s27 }
  0x14   : > { %p609_p12 = pneg %p805_p11 }
  0x15   : > { %p628_p10 = por %p627_p7, %p626_p5 }
  0x16   : > { %p621_p0 = pnand %p619_p13, %p609_p12 }
  0x18   : > { %p622_p3 = pneg %p621_p0 }
  0x1a   : > { %p629_p2 = pnand %p628_p10, %p622_p3 }
  0x1c   : > { %632 = shalt.err (!%p629_p2)
}
  0x1d   : > { %s732_s28 = smov 64   ;;  %s733_s29 = smov 4  }
  0x1e   : > { %543 = dma.hbm_to_vmem [thread:$0]  (!%p805_p11), %s925_s1, 2048, %s132_s22, [#allocation6], %s732_s28, %s732_s28, %s733_s29  }
  0x1f   : > { %p25_p9 = scmp.eq.s32.totalorder %s24_s26, 0  ;;  %p34_p12 = scmp.ne.s32.totalorder %s725_s14, %s721_s13 }
  0x20   : > { %p35_p10 = scmp.eq.s32.totalorder %s729_s15, 0  ;;  %p553_p2 = scmp.lt.s32.totalorder %s729_s15, 2 }
  0x21   : > { %s827_s5 = scalar_select %p25_p9, %s725_s14, %s27_s25  }
  0x22   : > { %p36_p13 = por %p35_p10, %p34_p12  ;;  %p936_p0 = scmp.eq.s32.totalorder %s777_s16, 1 }
  0x23   : > { %s148_s7 = sand.u32 1, %s725_s14   ;;  %s509_s8 = sshll.u32 %s729_s15, 8 }
  0x24   : > { %p831_p3 = por %p936_p0, %p34_p12  ;;  %s481_s9 = sshll.u32 %s148_s7, 4 }
  0x25   : > { %s840_s17 = scalar_lea.hbm %s924_s0, %s509_s8  ;;  %s152_s21 = scalar_lea.vmem [#allocation2], %s481_s9 }
  0x26   : > { %s937_s6 = scalar_select %p831_p3, 1, 0 }
  0x27   : > { %s160_s22 = sshll.u32 %s152_s21, 4  ;;  %p842_p11 = pnand %p553_p2, %p36_p13  ;;  %s161_s22 = int_to_ptr.vmem [resolvable:$true] %s160_s22 }
  0x28   : > { %s149_s25 = scalar_lea.sflag [#allocation3], %s148_s7  ;;  %s633_s26 = scalar_lea.hbm %s840_s17, 256 }
  0x29   : > { %p634_p5 = scmp.ne.s32.totalorder %s840_s17, %s633_s26  ;;  %p635_p7 = pneg %p842_p11 }
  0x2a   : > { %s638_s29 = scalar_lea.hbm %s924_s0, 512  ;;  %p639_p10 = scmp.lt.s32.totalorder %s840_s17, %s924_s0 }
  0x2b   : > { %p636_p9 = pnand %p635_p7, %p634_p5  ;;  %p640_p2 = scmp.lt.s32.totalorder %s638_s29, %s633_s26 }
  0x2d   : > { %p637_p12 = pneg %p636_p9  ;;  %p641_p13 = por %p640_p2, %p639_p10 }
  0x2f   : > { %p642_p0 = pnand %p641_p13, %p637_p12 }
  0x31   : > { %645 = shalt.err (!%p642_p0)
}
  0x32   : > { %s646_s8 = scalar_lea.vmem %s161_s22, 256  ;;  %s734_s7 = smov [#allocation2]  }
  0x33   : > { %p647_p1 = scmp.ne.s32.totalorder %s161_s22, %s646_s8  ;;  %s651_s9 = sshll.u32 %s734_s7, 4  ;;  %s652_s9 = int_to_ptr.vmem [resolvable:$false] %s651_s9 }
  0x34   : > { %s653_s10 = scalar_lea.vmem %s652_s9, 512  ;;  %p654_p5 = scmp.lt.s32.totalorder %s161_s22, %s652_s9 }
  0x35   : > { %p649_p6 = pnand %p647_p1, %p635_p7  ;;  %p655_p9 = scmp.lt.s32.totalorder %s653_s10, %s646_s8 }
  0x37   : > { %p650_p3 = pneg %p649_p6  ;;  %p656_p4 = por %p655_p9, %p654_p5 }
  0x39   : > { %p657_p8 = pnand %p656_p4, %p650_p3 }
  0x3b   : > { %660 = shalt.err (!%p657_p8)
}
  0x3c   : > { %547 = dma.hbm_to_vmem [thread:$0]  (!%p842_p11), %s840_s17, 256, %s161_s22, %s149_s25  }
  0x3d   : > { %p939_p12 = scmp.ne.s32.totalorder %s934_s20, 0 }
  0x3e   : > { %s863_s11 = sand.u32 (!%p939_p12), 1, %s721_s13   ;;  %p940_p1 = scmp.ne.s32.totalorder (!%p939_p12), %s932_s18, 0 }
  0x3f   : > { %169 = sbr.rel (%p939_p12) target bundleno = 317 (0x13d), region = 32  ;;  %s485_s21 = sshll.u32 (!%p939_p12), %s863_s11, 4 }
  0x40   : > { %s172_s26 = scalar_lea.sflag (!%p939_p12), [#allocation3], %s863_s11  ;;  %s867_s27 = scalar_lea.vmem (!%p939_p12), [#allocation2], %s485_s21 }
  0x44   : > { %704 = dma.done.wait (%p940_p1), %s172_s26, 256  }
  0x45   : > { %706 = vsyncadd (%p940_p1), %s172_s26, 4294967040  ;;  %p941_p4 = scmp.eq.s32.totalorder %s777_s16, 0 }
  0x47   : > { %708 = dma.done.wait (%p941_p4), [#allocation6], 2048   ;;  %p942_p6 = pmov %p941_p4 }
  0x48   : > { %v591_v0 = vld [vmem:[#allocation5 + $0x78] sm:$0xff]   ;;  %v593_v2 = vld [vmem:[#allocation5 + $0x70] sm:$0xff]   ;;  %v595_v4 = vld [vmem:[#allocation5 + $0x68] sm:$0xff]   ;;  %s487_s18 = sshll.u32 %s863_s11, 3  ;;  %s506_s22 = sshll.u32 %s777_s16, 7 }
  0x49   : > { %710 = vsyncadd (%p942_p6), [#allocation6], 4294965248  ;;  %v592_v1 = vld [vmem:[#allocation5 + $0x38] sm:$0xff]   ;;  %510 = vmatprep.subr.bf16.mxu0 %v591_v0  ;;  %v594_v3 = vld [vmem:[#allocation5 + $0x30] sm:$0xff]   ;;  %s201_s23 = scalar_lea.vmem [#allocation7], %s487_s18  ;;  %s887_s30 = scalar_lea.hbm %s927_s3, %s506_s22 }
  0x4a   : > { %511 = vmatpush3.bf16.msra.mxu0 %v592_v1  ;;  %v596_v5 = vld [vmem:[#allocation5 + $0x28] sm:$0xff]   ;;  %v597_v6 = vld [vmem:[#allocation5 + $0x60] sm:$0xff]   ;;  %v599_v8 = vld [vmem:[#allocation5 + $0x58] sm:$0xff]   ;;  %s397_s25 = sshll.u32 %s201_s23, 4  ;;  %s384_s4 = scalar_lea.sflag [#allocation4], %s863_s11  ;;  %s398_s25 = int_to_ptr.vmem [resolvable:$true] %s397_s25 }
  0x4b   : > { %512 = vmatprep.subr.bf16.mxu0 %v593_v2  ;;  %v598_v7 = vld [vmem:[#allocation5 + $0x20] sm:$0xff]   ;;  %v600_v9 = vld [vmem:[#allocation5 + $0x18] sm:$0xff]   ;;  %v601_v10 = vld [vmem:[#allocation5 + $0x50] sm:$0xff]   ;;  %s661_s8 = scalar_lea.vmem %s398_s25, 128  ;;  %p943_p3 = scmp.ne.s32.totalorder %s937_s6, 0 }
  0x4c   : > { %v204_v11 = vld [vmem:[%s867_s27 + $0x8] sm:$0xff]  ;;  %v602_v13 = vld [vmem:[#allocation5 + $0x10] sm:$0xff]   ;;  %v605_v16 = vld [vmem:[#allocation5 + $0x40] sm:$0xff]   ;;  %p662_p8 = scmp.ne.s32.totalorder %s398_s25, %s661_s8  ;;  %s735_s16 = smov [#allocation7]  }
  0x4d   : > { %v206_v12 = vpack.c.bf16 %v204_v11, %v204_v11  ;;  %v603_v14 = vld [vmem:[#allocation5 + $0x48] sm:$0xff]   ;;  %v606_v17 = vld [vmem:[#allocation5] sm:$0xff]   ;;  %s665_s7 = sshll.u32 %s735_s16, 4  ;;  %s666_s7 = int_to_ptr.vmem [resolvable:$false] %s665_s7 }
  0x4e   : > { %513 = vmatpush3.bf16.msra.mxu0 %v594_v3  ;;  %v604_v15 = vld [vmem:[#allocation5 + $0x8] sm:$0xff]   ;;  %v203_v18 = vld [vmem:[%s867_s27] sm:$0xff]  ;;  %p663_p11 = pnand %p662_p8, %p943_p3  ;;  %s667_s9 = scalar_lea.vmem %s666_s7, 256 }
  0x4f   : > { %514 = vmatprep.subr.bf16.mxu0 %v595_v4  ;;  %374 = vmatprep.mubr.bf16.mxu0 %v206_v12  ;;  %v205_v19 = vpack.c.bf16 %v203_v18, %v203_v18  ;;  %v488_v21 = vld [vmem:[%s926_s2] ss:$0 sm:$0xff]  ;;  %p668_p10 = scmp.lt.s32.totalorder %s398_s25, %s666_s7  ;;  %p669_p2 = scmp.lt.s32.totalorder %s667_s9, %s661_s8 }
  0x50   : > { %p664_p7 = pneg %p663_p11 }
  0x51   : > { %p670_p13 = por %p669_p2, %p668_p10 }
  0x52   : > { %515 = vmatpush3.bf16.msra.mxu0 %v596_v5 }
  0x53   : > { %516 = vmatprep.subr.bf16.mxu0 %v597_v6  ;;  %p671_p0 = pnand %p670_p13, %p664_p7 }
  0x56   : > { %517 = vmatpush3.bf16.msra.mxu0 %v598_v7 }
  0x57   : > { %518 = vmatprep.subr.bf16.mxu0 %v599_v8 }
  0x5a   : > { %519 = vmatpush3.bf16.msra.mxu0 %v600_v9 }
  0x5b   : > { %520 = vmatprep.subr.bf16.mxu0 %v601_v10 }
  0x5e   : > { %521 = vmatpush3.bf16.msra.mxu0 %v602_v13 }
  0x5f   : > { %522 = vmatprep.subr.bf16.mxu0 %v603_v14 }
  0x62   : > { %523 = vmatpush3.bf16.msra.mxu0 %v604_v15 }
  0x63   : > { %524 = vmatprep.subr.bf16.mxu0 %v605_v16 }
  0x66   : > { %525 = vmatpush3.bf16.msra.mxu0 %v606_v17 }
  0x69   : > { %375 = vmatmul.mubr.bf16.vlgmr.msra.gmra.mxu0 %v205_v19 }
 0x129   : > { %v526_v20 = vpop.f32.mrf.mxu0 }
 0x12b   : > { %v527_v22 = vpop.f32.mrf.mxu0 }
 0x12c   : > { %v528_v23 = vadd.f32 %v527_v22, %v526_v20 }
 0x12d   : > { %v529_v24 = vpop.f32.mrf.mxu0 }
 0x12e   : > { %v377_v25 = vadd.f32 %v528_v23, %v488_v21 }
 0x12f   : > { %v530_v26 = vpop.f32.mrf.mxu0 }
 0x130   : > { %382 = vst [vmem:[%s201_s23] sm:$0xff] %v377_v25 }
 0x131   : > { %674 = shalt.err (!%p671_p0)
}
 0x132   : > { %s675_s10 = scalar_lea.hbm %s887_s30, 128  ;;  %s679_s26 = scalar_lea.hbm %s927_s3, 256 }
 0x133   : > { %p676_p5 = scmp.ne.s32.totalorder %s887_s30, %s675_s10  ;;  %p680_p1 = scmp.lt.s32.totalorder %s887_s30, %s927_s3 }
 0x134   : > { %p681_p4 = scmp.lt.s32.totalorder %s679_s26, %s675_s10 }
 0x135   : > { %p677_p9 = pnand %p676_p5, %p943_p3 }
 0x136   : > { %p682_p6 = por %p681_p4, %p680_p1 }
 0x137   : > { %p678_p12 = pneg %p677_p9 }
 0x139   : > { %p683_p8 = pnand %p682_p6, %p678_p12 }
 0x13b   : > { %686 = shalt.err (!%p683_p8)
}
 0x13c   : > { %538 = dma.vmem_to_hbm [thread:$0]  (%p943_p3), %s398_s25, 128, %s887_s30, %s384_s4  }
 0x13d PF: > { %s409_s20 = sand.u32 1, %s717_s12   ;;  %p944_p11 = scmp.ne.s32.totalorder %s933_s19, 0 }
 0x13e   : > { %p945_p7 = scmp.ge.s32.totalorder %s729_s15, 2  ;;  %s410_s17 = scalar_lea.sflag [#allocation4], %s409_s20 }
 0x140   : > { %p549_p10 = pnand %p945_p7, %p944_p11 }
 0x142   : > { %p550_p2 = pneg %p549_p10 }
 0x144   : > { %712 = dma.done.wait (%p550_p2), %s410_s17, 128  }
 0x145   : > { %714 = vsyncadd (%p550_p2), %s410_s17, 4294967168  ;;  %p17_p13 = scmp.ge.s32.totalorder %s810_s24, 4   ;;  %s946_s12 = smov %s721_s13 }
 0x146   : > { %s947_s13 = smov %s725_s14  ;;  %s948_s14 = smov %s827_s5 }
 0x147   : > { %s949_s15 = smov %s810_s24  ;;  %19 = sbr.rel (!%p17_p13) target bundleno = 6 (0x6), region = 81 }
 0x14c   :  { %415 = vsyncpa [#allocation3], 1 }
 0x14d   :  { %417 = vsyncpa [#allocation3 + $0x1], 1 }
 0x14e   :  { %418 = vsyncpa [#allocation6], 1 }
 0x14f   :  { %419 = vsyncpa [#allocation4], 1 }
 0x150   :  { %421 = vsyncpa [#allocation4 + $0x1], 1 }

</bundles_post_ra>
